<compile_context>
chip_gen: v7x
topology: tpu7x:2x2x1
jax: 0.10.0
libtpu: 0.0.40
codegen_flags: <defaults>
</compile_context>

<pallas_src>
import functools
import math

import jax
import jax.numpy as jnp
from jax import lax
from jax.experimental import pallas as pl
from jax.experimental.pallas import tpu as pltpu


_EPS = 1e-8
_VMEM_STEP_BUDGET = 8 * 1024 * 1024        # per-grid-step budget (fits every gen)
_VMEM_LIMIT = 32 * 1024 * 1024             # >= v5e's 16 MiB default, <= v7x physical


def _round_up(a, b):
    return ((a + b - 1) // b) * b


# --------------------------- elementwise (rows) path --------------------------
def _cosine_rows_kernel(x_ref, y_ref, o_ref, *, inv_temp, eps):
    """x_ref, y_ref: (tm, H) rows; o_ref: (tm, 1) cosine similarity / temp."""
    x = x_ref[...].astype(jnp.float32)
    y = y_ref[...].astype(jnp.float32)

    dot = jnp.sum(x * y, axis=-1, keepdims=True)   # (tm, 1)
    nx2 = jnp.sum(x * x, axis=-1, keepdims=True)   # ||x||^2
    ny2 = jnp.sum(y * y, axis=-1, keepdims=True)   # ||y||^2

    # 1 / max(||x||*||y||, eps) == rsqrt(max(||x||^2*||y||^2, eps^2))   (EUP)
    inv = lax.rsqrt(jnp.maximum(nx2 * ny2, eps * eps))
    o_ref[...] = (dot * inv * inv_temp).astype(o_ref.dtype)


def _cosine_rows(x2, y2, temp, eps, out_dtype):
    """x2, y2: (M, H) with identical shapes -> (M,)."""
    M, H = x2.shape
    in_bytes = x2.dtype.itemsize + y2.dtype.itemsize

    # Per-row VMEM: 2x double-buffered inputs + ~5 live f32 (tm,H) temporaries.
    per_row = H * (2 * in_bytes + 20) + 64
    tm = max(8, min(1024, (_VMEM_STEP_BUDGET // per_row) // 8 * 8))
    tm = min(tm, _round_up(M, 8))
    Mpad = _round_up(M, tm)

    if Mpad != M:   # zero rows -> dot=0, norms=0 -> output 0; sliced off below
        x2 = jnp.pad(x2, ((0, Mpad - M), (0, 0)))
        y2 = jnp.pad(y2, ((0, Mpad - M), (0, 0)))

    kern = functools.partial(_cosine_rows_kernel,
                             inv_temp=1.0 / float(temp), eps=float(eps))
    # NOTE: output is (tm, 1) per step; output bytes are ~1/(2H) of the input
    # traffic for this HBM-bound kernel, so the masked-store epilogue is noise.
    out = pl.pallas_call(
        kern,
        out_shape=jax.ShapeDtypeStruct((Mpad, 1), out_dtype),
        grid=(Mpad // tm,),
        in_specs=[pl.BlockSpec((tm, H), lambda i: (i, 0)),
                  pl.BlockSpec((tm, H), lambda i: (i, 0))],
        out_specs=pl.BlockSpec((tm, 1), lambda i: (i, 0)),
        compiler_params=pltpu.CompilerParams(
            dimension_semantics=("parallel",),
            vmem_limit_bytes=_VMEM_LIMIT),
    )(x2, y2)
    return out[:M, 0]


# ------------------------- broadcast / SimCSE (MXU) path ----------------------
def _cosine_cross_kernel(x_ref, yt_ref, o_ref, acc_ref, nx2_ref, ny2_ref, *,
                         inv_temp, eps):
    """x_ref: (tm, tk), yt_ref: (tk, tn) (= Y^T tile); o_ref: (tm, tn)."""
    k = pl.program_id(2)

    @pl.when(k == 0)
    def _():
        acc_ref[...] = jnp.zeros_like(acc_ref)
        nx2_ref[...] = jnp.zeros_like(nx2_ref)
        ny2_ref[...] = jnp.zeros_like(ny2_ref)

    a = x_ref[...]                                   # (tm, tk)
    b = yt_ref[...]                                  # (tk, tn)
    acc_ref[...] += jnp.dot(a, b, preferred_element_type=jnp.float32)   # MXU

    af = a.astype(jnp.float32)
    bf = b.astype(jnp.float32)
    nx2_ref[...] += jnp.sum(af * af, axis=1, keepdims=True)   # (tm, 1)
    ny2_ref[...] += jnp.sum(bf * bf, axis=0, keepdims=True)   # (1, tn)

    @pl.when(k == pl.num_programs(2) - 1)
    def _():
        denom2 = jnp.maximum(nx2_ref[...] * ny2_ref[...], eps * eps)  # (tm, tn)
        o_ref[...] = (acc_ref[...] * lax.rsqrt(denom2)
                      * inv_temp).astype(o_ref.dtype)


def _cosine_cross(x2, y2, temp, eps, out_dtype):
    """x2: (N, H), y2: (P, H) -> (N, P) cosine-sim matrix / temp (no broadcast
    materialization; dots via tiled X @ Y^T on the MXU)."""
    N, H = x2.shape
    P = y2.shape[0]

    tm = 256 if N > 256 else _round_up(N, 8)
    tn = 256 if P > 256 else _round_up(P, 128)
    tk = 512 if H > 1024 else H                       # tile K only when H is big

    Npad = _round_up(N, tm)
    Ppad = _round_up(P, tn)
    Hpad = _round_up(H, tk)

    x2 = jnp.pad(x2, ((0, Npad - N), (0, Hpad - H)))
    y2 = jnp.pad(y2, ((0, Ppad - P), (0, Hpad - H)))
    yt = y2.T                                          # (Hpad, Ppad) layout glue

    kern = functools.partial(_cosine_cross_kernel,
                             inv_temp=1.0 / float(temp), eps=float(eps))
    out = pl.pallas_call(
        kern,
        out_shape=jax.ShapeDtypeStruct((Npad, Ppad), out_dtype),
        grid=(Npad // tm, Ppad // tn, Hpad // tk),
        in_specs=[pl.BlockSpec((tm, tk), lambda i, j, k: (i, k)),
                  pl.BlockSpec((tk, tn), lambda i, j, k: (k, j))],
        out_specs=pl.BlockSpec((tm, tn), lambda i, j, k: (i, j)),
        scratch_shapes=[pltpu.VMEM((tm, tn), jnp.float32),   # acc
                        pltpu.VMEM((tm, 1), jnp.float32),    # ||x||^2 partial
                        pltpu.VMEM((1, tn), jnp.float32)],   # ||y||^2 partial
        compiler_params=pltpu.CompilerParams(
            dimension_semantics=("parallel", "parallel", "arbitrary"),
            vmem_limit_bytes=_VMEM_LIMIT),
    )(x2, yt)
    return out[:N, :P]


# ----------------------------------- wrapper ----------------------------------
def similarity(x, y, temp, eps=_EPS):
    """Cosine similarity over the last axis divided by `temp` (Similarity.forward)."""
    x = jnp.asarray(x)
    y = jnp.asarray(y)
    if x.shape[-1] != y.shape[-1]:
        raise ValueError("feature dims must match")
    H = x.shape[-1]
    out_dtype = jnp.promote_types(x.dtype, y.dtype)
    out_batch = jnp.broadcast_shapes(x.shape[:-1], y.shape[:-1])

    # Same-shape elementwise case.
    if x.shape[:-1] == y.shape[:-1]:
        M = max(1, math.prod(out_batch))
        out = _cosine_rows(x.reshape(M, H), y.reshape(M, H), temp, eps, out_dtype)
        return out.reshape(out_batch)

    # Outer-product broadcast case (e.g. SimCSE (N,1,H) x (1,P,H)): all axes
    # where x varies precede all axes where y varies -> tiled MXU X @ Y^T.
    r = len(out_batch)
    bx = (1,) * (r - (x.ndim - 1)) + x.shape[:-1]
    by = (1,) * (r - (y.ndim - 1)) + y.shape[:-1]
    ax_x = [a for a in range(r) if bx[a] > 1]
    ax_y = [a for a in range(r) if by[a] > 1]
    if ax_x and ax_y and max(ax_x) < min(ax_y) \
            and all(by[a] == 1 for a in ax_x) and all(bx[a] == 1 for a in ax_y):
        Mx = math.prod(bx)
        My = math.prod(by)
        out = _cosine_cross(x.reshape(Mx, H), y.reshape(My, H), temp, eps, out_dtype)
        return out.reshape(out_batch)

    # General fallback: materialize the broadcast (rare; correctness only).
    xb, yb = jnp.broadcast_arrays(x, y)
    M = max(1, math.prod(out_batch))
    out = _cosine_rows(xb.reshape(M, H), yb.reshape(M, H), temp, eps, out_dtype)
    return out.reshape(out_batch)


# ---------------------------------- reference ---------------------------------
def _reference(x, y, temp, eps=_EPS):
    dot = jnp.sum(x * y, axis=-1)
    nx = jnp.sqrt(jnp.sum(x * x, axis=-1))
    ny = jnp.sqrt(jnp.sum(y * y, axis=-1))
    return dot / jnp.maximum(nx * ny, eps) / temp


# ------------------------------------- main ------------------------------------
if __name__ == "__main__":
    key = jax.random.PRNGKey(0)
    kx, ky, ka, kb = jax.random.split(key, 4)

    B, S, H = 2, 8, 32
    temp = 0.05

    x = jax.random.normal(kx, (B, S, H), jnp.float32)
    y = jax.random.normal(ky, (B, S, H), jnp.float32)

    # 1) elementwise same-shape case: (B, S, H) x (B, S, H) -> (B, S)
    out = similarity(x, y, temp)
    jax.block_until_ready(out)
    assert out.shape == (B, S), out.shape
    assert jnp.allclose(out, _reference(x, y, temp), rtol=1e-5, atol=1e-5)

    # 2) SimCSE-style broadcast case (MXU path): (N,1,H) x (1,N,H) -> (N, N)
    z1 = x.reshape(B * S, H)
    z2 = y.reshape(B * S, H)
    sim_mat = similarity(z1[:, None, :], z2[None, :, :], temp)
    jax.block_until_ready(sim_mat)
    assert sim_mat.shape == (B * S, B * S), sim_mat.shape
    assert jnp.allclose(sim_mat,
                        _reference(z1[:, None, :], z2[None, :, :], temp),
                        rtol=1e-5, atol=1e-5)

    # 3) bf16 inputs stay bf16 in HBM (f32 math on-chip).
    z1b = z1.astype(jnp.bfloat16)
    z2b = z2.astype(jnp.bfloat16)
    sim_b16 = similarity(z1b[:, None, :], z2b[None, :, :], temp)
    jax.block_until_ready(sim_b16)
    assert sim_b16.dtype == jnp.bfloat16
    ref_b16 = _reference(z1b.astype(jnp.float32)[:, None, :],
                         z2b.astype(jnp.float32)[None, :, :], temp)
    assert jnp.allclose(sim_b16.astype(jnp.float32), ref_b16, rtol=2e-2, atol=2e-2)

    # 4) row count that is not a multiple of 8 (padded in the wrapper).
    a = jax.random.normal(ka, (13, H), jnp.float32)
    b = jax.random.normal(kb, (13, H), jnp.float32)
    out13 = similarity(a, b, temp)
    jax.block_until_ready(out13)
    assert out13.shape == (13,), out13.shape
    assert jnp.allclose(out13, _reference(a, b, temp), rtol=1e-5, atol=1e-5)

    print("KERNEL_OK")
</pallas_src>

<mosaic_0001>
module attributes {stable_mosaic.version = 11 : i64} {
  func.func @_cosine_rows_kernel(%arg0: i32, %arg1: memref<16x32xf32, #tpu.memory_space<vmem>>, %arg2: memref<16x32xf32, #tpu.memory_space<vmem>>, %arg3: memref<16x1xf32, #tpu.memory_space<vmem>>) attributes {dimension_semantics = [#tpu.dimension_semantics<parallel>], iteration_bounds = array<i64: 1>, scalar_prefetch = 0 : i64, scratch_operands = 0 : i64, tpu.core_type = #tpu.core_type<tc>, window_params = [{transform_indices = @transform_0, window_bounds = array<i64: 16, 32>}, {transform_indices = @transform_1, window_bounds = array<i64: 16, 32>}, {transform_indices = @transform_2, window_bounds = array<i64: 16, 1>}]} {
    %c0 = arith.constant 0 : index
    %c0_0 = arith.constant 0 : index
    %0 = vector.load %arg1[%c0, %c0_0] : memref<16x32xf32, #tpu.memory_space<vmem>>, vector<16x32xf32>
    %c0_1 = arith.constant 0 : index
    %c0_2 = arith.constant 0 : index
    %1 = vector.load %arg2[%c0_1, %c0_2] : memref<16x32xf32, #tpu.memory_space<vmem>>, vector<16x32xf32>
    %2 = arith.mulf %0, %1 : vector<16x32xf32>
    %cst = arith.constant dense<0.000000e+00> : vector<16xf32>
    %3 = vector.multi_reduction <add>, %2, %cst [1] : vector<16x32xf32> to vector<16xf32>
    %4 = vector.shape_cast %3 : vector<16xf32> to vector<16x1xf32>
    %5 = arith.mulf %0, %0 : vector<16x32xf32>
    %cst_3 = arith.constant dense<0.000000e+00> : vector<16xf32>
    %6 = vector.multi_reduction <add>, %5, %cst_3 [1] : vector<16x32xf32> to vector<16xf32>
    %7 = vector.shape_cast %6 : vector<16xf32> to vector<16x1xf32>
    %8 = arith.mulf %1, %1 : vector<16x32xf32>
    %cst_4 = arith.constant dense<0.000000e+00> : vector<16xf32>
    %9 = vector.multi_reduction <add>, %8, %cst_4 [1] : vector<16x32xf32> to vector<16xf32>
    %10 = vector.shape_cast %9 : vector<16xf32> to vector<16x1xf32>
    %11 = arith.mulf %7, %10 : vector<16x1xf32>
    %cst_5 = arith.constant 1.000000e-16 : f32
    %12 = vector.broadcast %cst_5 : f32 to vector<16x1xf32>
    %13 = arith.maximumf %11, %12 : vector<16x1xf32>
    %14 = math.rsqrt %13 : vector<16x1xf32>
    %15 = arith.mulf %4, %14 : vector<16x1xf32>
    %cst_6 = arith.constant 2.000000e+01 : f32
    %16 = vector.broadcast %cst_6 : f32 to vector<16x1xf32>
    %17 = arith.mulf %15, %16 : vector<16x1xf32>
    %c0_7 = arith.constant 0 : index
    %c0_8 = arith.constant 0 : index
    %18 = vector.load %arg3[%c0_7, %c0_8] : memref<16x1xf32, #tpu.memory_space<vmem>>, vector<16x1xf32>
    tpu.vector_store %arg3[%c0_7, %c0_8], %17 {strides = array<i32>} : memref<16x1xf32, #tpu.memory_space<vmem>>, vector<16x1xf32>,
    return
  }
  func.func @transform_0(%arg0: i32) -> (i32, i32) {
    %c0_i32 = arith.constant 0 : i32
    %c0_i32_0 = arith.constant 0 : i32
    return %arg0, %c0_i32 : i32, i32
  }
  func.func @transform_1(%arg0: i32) -> (i32, i32) {
    %c0_i32 = arith.constant 0 : i32
    %c0_i32_0 = arith.constant 0 : i32
    return %arg0, %c0_i32 : i32, i32
  }
  func.func @transform_2(%arg0: i32) -> (i32, i32) {
    %c0_i32 = arith.constant 0 : i32
    %c0_i32_0 = arith.constant 0 : i32
    return %arg0, %c0_i32 : i32, i32
  }
}

</mosaic_0001>

<bundles_post_ra>
// kernel: tpu_custom_call.1
= control target key start
LH: loop header
LB: loop body
LE: loop exit
PB: predicated region body
PF: predicated region fallthrough
CT: control target
= control target key end

     0   :  { %7 = vsyncpa [#allocation3], 0  ;;  %s198_s0 = inlined_call_operand.hbm [shape: f32[16,32], index: 0, kind: input, shape index: {}]   ;;  %s199_s1 = inlined_call_operand.hbm [shape: f32[16,32], index: 1, kind: input, shape index: {}]   ;;  %s200_s2 = inlined_call_operand.vmem [shape: f32[16,1], index: 2, kind: output, shape index: {}]  }
   0x1   :  { %8 = vsyncpa [#allocation5], 0  ;;  %s143_s9 = smov [#allocation2]   ;;  %s95_s13 = scalar_lea.hbm %s198_s0, 256 }
   0x2   :  { %s14_s10 = sshll.u32 %s143_s9, 4  ;;  %p96_p0 = scmp.ne.s32.totalorder %s198_s0, %s95_s13  ;;  %s15_s10 = int_to_ptr.vmem [resolvable:$true] %s14_s10 }
   0x3   :  { %p99_p1 = scmp.lt.u32.totalorder %s95_s13, %s198_s0 }
   0x5   :  { %p101_p2 = pnand %p99_p1, %p96_p0 }
   0x7   :  { %104 = shalt.err (!%p101_p2)
}
   0x8   :  { %s105_s18 = scalar_lea.vmem %s15_s10, 256  ;;  %p110_p4 = scmp.lt.s32.totalorder %s15_s10, %s15_s10 }
   0x9   :  { %p106_p3 = scmp.ne.s32.totalorder %s15_s10, %s105_s18  ;;  %p111_p5 = scmp.lt.s32.totalorder %s105_s18, %s105_s18 }
   0xb   :  { %p112_p6 = por %p111_p5, %p110_p4 }
   0xd   :  { %p113_p7 = pnand %p112_p6, %p106_p3 }
   0xf   :  { %116 = shalt.err (!%p113_p7)
}
  0x10   :  { %s144_s19 = smov 128   ;;  %s145_s20 = smov 8  }
  0x11   :  { %20 = dma.hbm_to_vmem [thread:$0]  %s198_s0, 256, %s15_s10, [#allocation3], %s144_s19, %s144_s19, %s145_s20  }
  0x12   :  { %s146_s23 = smov [#allocation4]   ;;  %s117_s27 = scalar_lea.hbm %s199_s1, 256 }
  0x13   :  { %s26_s24 = sshll.u32 %s146_s23, 4  ;;  %p118_p8 = scmp.ne.s32.totalorder %s199_s1, %s117_s27  ;;  %s27_s24 = int_to_ptr.vmem [resolvable:$true] %s26_s24 }
  0x14   :  { %p121_p9 = scmp.lt.u32.totalorder %s117_s27, %s199_s1 }
  0x16   :  { %p123_p10 = pnand %p121_p9, %p118_p8 }
  0x18   :  { %126 = shalt.err (!%p123_p10)
}
  0x19   :  { %s127_s4 = scalar_lea.vmem %s27_s24, 256  ;;  %p132_p12 = scmp.lt.s32.totalorder %s27_s24, %s27_s24 }
  0x1a   :  { %p128_p11 = scmp.ne.s32.totalorder %s27_s24, %s127_s4  ;;  %p133_p13 = scmp.lt.s32.totalorder %s127_s4, %s127_s4 }
  0x1c   :  { %p134_p0 = por %p133_p13, %p132_p12 }
  0x1e   :  { %p135_p1 = pnand %p134_p0, %p128_p11 }
  0x20   :  { %138 = shalt.err (!%p135_p1)
}
  0x21   :  { %32 = dma.hbm_to_vmem [thread:$0]  %s199_s1, 256, %s27_s24, [#allocation5], %s144_s19, %s144_s19, %s145_s20  }
  0x22   :  { %139 = dma.done.wait [#allocation3], 256  }
  0x23   :  { %140 = vsyncadd [#allocation3], 4294967040 }
  0x24   :  { %141 = dma.done.wait [#allocation5], 256  }
  0x25   :  { %142 = vsyncadd [#allocation5], 4294967040  ;;  %v41_v0 = vld [vmem:[#allocation4] sm:$0xff]  ;;  %vm45_vm0 = vcmask 261120   ;;  %v39_v1 = vld [vmem:[#allocation2] sm:$0xff]  ;;  %vm78_vm1 = vcmask 7168  }
  0x26   :  { %v42_v2 = vld [vmem:[#allocation4 + $0x8] sm:$0xff]  ;;  %v60_v3 = vmul.f32 %v41_v0, %v41_v0  ;;  %v52_v4 = vmul.f32 %v39_v1, %v39_v1  ;;  %v40_v6 = vld [vmem:[#allocation2 + $0x8] sm:$0xff]  ;;  %v43_v12 = vmul.f32 %v41_v0, %v39_v1 }
  0x27   :  { %v61_v5 = vmul.f32 %v42_v2, %v42_v2  ;;  %v53_v7 = vmul.f32 %v40_v6, %v40_v6  ;;  %v44_v13 = vmul.f32 %v42_v2, %v40_v6 }
  0x28   :  { %v62_v8 = vsel %vm45_vm0, %v60_v3, 0.0  ;;  %v54_v9 = vsel %vm45_vm0, %v52_v4, 0.0  ;;  %v46_v14 = vsel %vm45_vm0, %v43_v12, 0.0 }
  0x29   :  { %63 = vadd.xlane.f32.xlu1 %v62_v8  ;;  %55 = vadd.xlane.f32.xlu0 %v54_v9  ;;  %v65_v10 = vsel %vm45_vm0, %v61_v5, 0.0  ;;  %v57_v11 = vsel %vm45_vm0, %v53_v7, 0.0  ;;  %v49_v15 = vsel %vm45_vm0, %v44_v13, 0.0 }
  0x2d   :  { %66 = vadd.xlane.f32.xlu1 %v65_v10  ;;  %58 = vadd.xlane.f32.xlu0 %v57_v11 }
  0x31   :  { %47 = vadd.xlane.f32.xlu0 %v46_v14  ;;  %50 = vadd.xlane.f32.xlu1 %v49_v15 }
  0xb6   :  { %v64_v16 = vpop.xlane.xlu1 %63  ;;  %v56_v17 = vpop.xlane.xlu0 %55 }
  0xb7   :  { %v68_v18 = vmul.f32 %v64_v16, %v56_v17 }
  0xb9   :  { %v70_v19 = vmax.f32 %v68_v18, 1e-16 }
  0xba   :  { %v67_v20 = vpop.xlane.xlu1 %66  ;;  %v59_v21 = vpop.xlane.xlu0 %58 }
  0xbb   :  { %91 = vrsqrt.f32 %v70_v19  ;;  %v69_v22 = vmul.f32 %v67_v20, %v59_v21 }
  0xbd   :  { %v71_v23 = vmax.f32 %v69_v22, 1e-16 }
  0xbe   :  { %v48_v24 = vpop.xlane.xlu0 %47  ;;  %v51_v27 = vpop.xlane.xlu1 %50 }
  0xbf   :  { %93 = vrsqrt.f32 %v71_v23 }
  0xc5   :  { %v92_v25 = vpop.eup %91 }
  0xc6   :  { %v74_v26 = vmul.f32 %v92_v25, %v48_v24 }
  0xc8   :  { %v76_v28 = vmul.f32 20.0, %v74_v26 }
  0xc9   :  { %v94_v29 = vpop.eup %93 }
  0xca   :  { %79 = vst.msk [vmem:[%s200_s2] sm:$0xff] %vm78_vm1, %v76_v28  ;;  %v75_v30 = vmul.f32 %v94_v29, %v51_v27 }
  0xcc   :  { %v77_v31 = vmul.f32 20.0, %v75_v30 }
  0xce   :  { %80 = vst.msk [vmem:[%s200_s2 + $0x8] sm:$0xff] %vm78_vm1, %v77_v31 }
  0xcf   :  { %85 = vsyncpa [#allocation3], 1 }
  0xd0   :  { %86 = vsyncpa [#allocation5], 1 }

</bundles_post_ra>
